<compile_context>
chip_gen: v5e
topology: v5e:2x2
jax: 0.10.0
libtpu: 0.0.40
codegen_flags: <defaults>
</compile_context>

<pallas_src>
import functools
import math

import jax
import jax.numpy as jnp
from jax.experimental import pallas as pl
from jax.experimental.pallas import tpu as pltpu


def _round_up(v, m):
    return (v + m - 1) // m * m


def _stft_loss_tile_kernel(xf_ref, yf_ref, basis_ref, out_ref):
    """One M-tile of frames (both signals) -> three partial sums.

    xf_ref, yf_ref : (tile_m, k_pad)      VMEM bf16  framed signals (window folded into basis)
    basis_ref      : (k_pad, 2*pad_half)  VMEM bf16  [cos 0..H-1 | nyq-cos, sin 1..H-1], zero-padded
    out_ref        : (1, 8, 128)          VMEM f32   partials at lanes {0,1,2} of sublane 0:
                     sum (y_mag-x_mag)^2, sum y_mag^2, sum |log y_mag - log x_mag|
    """
    basis = basis_ref[...]
    pad_half = basis.shape[1] // 2

    # Single tiny (1, pad_half) mask: drop the Nyquist column (second-half col 0)
    # from the paired-bin power grid.  No full-tile iota/where masking anywhere.
    cols = jax.lax.broadcasted_iota(jnp.int32, (1, pad_half), 1)
    nyq_mask = (cols > 0).astype(jnp.float32)

    def powers(fr_ref):
        # One fused bf16 MXU matmul per signal tile; f32 accumulation.
        spec = jnp.dot(fr_ref[...], basis, preferred_element_type=jnp.float32)
        a = spec[:, :pad_half]          # re_k  for k = 0..H-1  (0 in padded cols)
        b = spec[:, pad_half:]          # col 0: re_Nyquist; cols 1..H-1: im_k
        pa = a * a
        pb = b * b
        p_main = jnp.maximum(pa + pb * nyq_mask, 1e-7)   # bins 0..H-1 (padding -> exactly 1e-7)
        p_nyq = jnp.maximum(pb[:, 0:1], 1e-7)            # bin H (Nyquist)
        return p_main, p_nyq

    px, px_n = powers(xf_ref)
    py, py_n = powers(yf_ref)

    # Spectral-convergence terms.  Padded rows/cols have px == py == 1e-7, so the
    # diff term needs no masking at all.
    dm = jnp.sqrt(py) - jnp.sqrt(px)
    dn = jnp.sqrt(py_n) - jnp.sqrt(px_n)
    sum_diff_sq = jnp.sum(dm * dm) + jnp.sum(dn * dn)

    # sum of y_mag^2; padded entries contribute exactly 1e-7 each and are
    # subtracted as a static constant in the wrapper.
    sum_y_sq = jnp.sum(py) + jnp.sum(py_n)

    # |log y_mag - log x_mag| = 0.5 * |log p_y - log p_x| with exact logs:
    # padded entries cancel to exactly 0 and there is no approx-reciprocal bias.
    sum_abs_log = 0.5 * (jnp.sum(jnp.abs(jnp.log(py) - jnp.log(px)))
                         + jnp.sum(jnp.abs(jnp.log(py_n) - jnp.log(px_n))))

    lane = jax.lax.broadcasted_iota(jnp.int32, (1, 8, 128), 2)
    out_ref[...] = jnp.where(
        lane == 0, sum_diff_sq,
        jnp.where(lane == 1, sum_y_sq,
                  jnp.where(lane == 2, sum_abs_log, 0.0)))


def _frame_signal(x, fft_size, hop_size):
    """Center-padded (reflect) framing, matching torch.stft(center=True)."""
    pad = fft_size // 2
    xp = jnp.pad(x, ((0, 0), (pad, pad)), mode="reflect")
    n_frames = 1 + x.shape[1] // hop_size
    idx = (jnp.arange(n_frames)[:, None] * hop_size
           + jnp.arange(fft_size)[None, :])
    return xp[:, idx]  # (B, n_frames, fft_size)


@functools.partial(jax.jit, static_argnames=("fft_size", "shift_size", "win_length"))
def stft_loss(x, y, *, fft_size=1024, shift_size=120, win_length=600):
    """Returns (sc_loss, mag_loss), matching STFTLoss.forward semantics."""
    assert fft_size % 2 == 0, "fft_size must be even"
    assert win_length <= fft_size
    x = x.astype(jnp.float32)
    y = y.astype(jnp.float32)
    B, T = x.shape
    assert T > fft_size // 2, "reflect padding requires T > fft_size // 2"

    half_bins = fft_size // 2
    n_bins = half_bins + 1
    pad_half = _round_up(half_bins, 128)      # 512 for fft=1024 -> MXU N = 1024
    k_pad = _round_up(fft_size, 128)

    # Periodic Hann window (torch.hann_window default), centered inside fft_size
    # exactly as torch.stft does when win_length < n_fft.
    n = jnp.arange(win_length, dtype=jnp.float32)
    hann = 0.5 * (1.0 - jnp.cos(2.0 * math.pi * n / win_length))
    lpad = (fft_size - win_length) // 2
    window = jnp.zeros((fft_size,), jnp.float32).at[lpad:lpad + win_length].set(hann)

    # Fused, window-folded real-DFT basis with the Nyquist column packed into the
    # (otherwise all-zero) sin(k=0) slot of the second half.
    nn = jnp.arange(fft_size, dtype=jnp.float32)[:, None]
    kk = jnp.arange(half_bins, dtype=jnp.float32)[None, :]
    ang = 2.0 * math.pi * nn * kk / fft_size
    cos_b = jnp.cos(ang) * window[:, None]                      # (fft_size, half_bins)
    sin_b = jnp.sin(ang) * window[:, None]
    nyq_col = window * jnp.where(jnp.arange(fft_size) % 2 == 0, 1.0, -1.0)  # (-1)^n * w
    basis = jnp.zeros((k_pad, 2 * pad_half), jnp.float32)
    basis = basis.at[:fft_size, :half_bins].set(cos_b)
    basis = basis.at[:fft_size, pad_half].set(nyq_col)
    basis = basis.at[:fft_size, pad_half + 1:pad_half + half_bins].set(sin_b[:, 1:])
    basis = basis.astype(jnp.bfloat16)

    # Frame both signals, collapse (B, frames) -> M rows, pad to a tile multiple.
    n_frames = 1 + T // shift_size
    m_total = B * n_frames
    # tile_m = 512 is the all-generation compromise (safe on v7x 64 MiB VMEM);
    # v5e/v6e (128 MiB VMEM) can raise this to 1024+ when tuned per generation.
    tile_m = min(512, _round_up(m_total, 16))     # multiple of 16 for bf16 sublanes
    m_pad = _round_up(m_total, tile_m)
    num_tiles = m_pad // tile_m

    def prep(sig):
        # bf16 BEFORE framing: the ~fft/hop-times overlapped framed tensor is
        # written + re-read from HBM at half width (identical numerics to
        # casting after framing, since framing is a pure gather).
        sig16 = sig.astype(jnp.bfloat16)
        fr = _frame_signal(sig16, fft_size, shift_size).reshape(m_total, fft_size)
        return jnp.pad(fr, ((0, m_pad - m_total), (0, k_pad - fft_size)))

    xf = prep(x)
    yf = prep(y)

    partials = pl.pallas_call(
        _stft_loss_tile_kernel,
        out_shape=jax.ShapeDtypeStruct((num_tiles, 8, 128), jnp.float32),
        grid_spec=pltpu.PrefetchScalarGridSpec(
            num_scalar_prefetch=0,
            grid=(num_tiles,),
            in_specs=[
                pl.BlockSpec((tile_m, k_pad), lambda i: (i, 0)),
                pl.BlockSpec((tile_m, k_pad), lambda i: (i, 0)),
                pl.BlockSpec((k_pad, 2 * pad_half), lambda i: (0, 0)),
            ],
            out_specs=pl.BlockSpec((1, 8, 128), lambda i: (i, 0, 0)),
        ),
        compiler_params=pltpu.CompilerParams(
            dimension_semantics=("parallel",),   # independent tiles -> megacore / 2-TC friendly
            vmem_limit_bytes=48 * 1024 * 1024,   # within v7x physical 64 MiB, ample on v5e/v6e
        ),
    )(xf, yf, basis)

    sums = jnp.sum(partials[:, 0, :], axis=0)    # (128,) reduce per-tile partials in JAX
    sum_diff_sq = sums[0]
    sum_abs_log = sums[2]
    # Every padded row/col entry contributed exactly 1e-7 to sum(y_mag^2).
    n_padded = m_pad * (pad_half + 1) - m_total * n_bins
    sum_y_sq = jnp.maximum(sums[1] - jnp.float32(n_padded * 1e-7), 0.0)

    sc_loss = jnp.sqrt(sum_diff_sq) / jnp.sqrt(sum_y_sq)        # ||y-x||_F / ||y||_F
    mag_loss = sum_abs_log / (B * n_frames * n_bins)            # mean L1 of log magnitudes
    return sc_loss, mag_loss


if __name__ == "__main__":
    # Small, module-consistent shapes: (B, T) signals; fft_size=128, hop=32, win=96.
    key = jax.random.PRNGKey(0)
    kx, ky = jax.random.split(key)
    B, T = 2, 256
    x = jax.random.normal(kx, (B, T), dtype=jnp.float32)
    y = jax.random.normal(ky, (B, T), dtype=jnp.float32)

    sc_loss, mag_loss = stft_loss(x, y, fft_size=128, shift_size=32, win_length=96)
    jax.block_until_ready((sc_loss, mag_loss))
    print("KERNEL_OK")
</pallas_src>

<mosaic_0001>
module attributes {stable_mosaic.version = 11 : i64} {
  func.func @_stft_loss_tile_kernel(%arg0: i32, %arg1: memref<32x128xbf16, #tpu.memory_space<vmem>>, %arg2: memref<32x128xbf16, #tpu.memory_space<vmem>>, %arg3: memref<128x256xbf16, #tpu.memory_space<vmem>>, %arg4: memref<1x8x128xf32, #tpu.memory_space<vmem>>) attributes {dimension_semantics = [#tpu.dimension_semantics<parallel>], iteration_bounds = array<i64: 1>, scalar_prefetch = 0 : i64, scratch_operands = 0 : i64, tpu.core_type = #tpu.core_type<tc>, window_params = [{transform_indices = @transform_0, window_bounds = array<i64: 32, 128>}, {transform_indices = @transform_1, window_bounds = array<i64: 32, 128>}, {pipeline_mode = #tpu.pipeline_mode<synchronous>, transform_indices = @transform_2, window_bounds = array<i64: 128, 256>}, {transform_indices = @transform_3, window_bounds = array<i64: 1, 8, 128>}]} {
    %c0 = arith.constant 0 : index
    %c0_0 = arith.constant 0 : index
    %0 = vector.load %arg3[%c0, %c0_0] : memref<128x256xbf16, #tpu.memory_space<vmem>>, vector<128x256xbf16>
    %1 = tpu.iota {dimensions = array<i32: 1>} : vector<1x128xi32>
    %c0_i32 = arith.constant 0 : i32
    %2 = vector.broadcast %c0_i32 : i32 to vector<1x128xi32>
    %3 = arith.cmpi sgt, %1, %2 : vector<1x128xi32>
    %4 = arith.extui %3 : vector<1x128xi1> to vector<1x128xi32>
    %5 = arith.sitofp %4 : vector<1x128xi32> to vector<1x128xf32>
    %c0_1 = arith.constant 0 : index
    %c0_2 = arith.constant 0 : index
    %6 = vector.load %arg1[%c0_1, %c0_2] : memref<32x128xbf16, #tpu.memory_space<vmem>>, vector<32x128xbf16>
    %cst = arith.constant dense<0.000000e+00> : vector<32x256xf32>
    %7 = tpu.matmul %6, %0, %cst {dimension_numbers = #tpu.dot_dimension_numbers<[1], [0], [0], [1], [0, 0, 1, 1], [], []>} : vector<32x128xbf16>, vector<128x256xbf16>, vector<32x256xf32> -> vector<32x256xf32>
    %8 = vector.extract_strided_slice %7 {offsets = [0, 0], sizes = [32, 128], strides = [1, 1]} : vector<32x256xf32> to vector<32x128xf32>
    %9 = vector.extract_strided_slice %7 {offsets = [0, 128], sizes = [32, 128], strides = [1, 1]} : vector<32x256xf32> to vector<32x128xf32>
    %10 = arith.mulf %8, %8 : vector<32x128xf32>
    %11 = arith.mulf %9, %9 : vector<32x128xf32>
    %12 = vector.broadcast %5 : vector<1x128xf32> to vector<32x128xf32>
    %13 = arith.mulf %11, %12 : vector<32x128xf32>
    %14 = arith.addf %10, %13 : vector<32x128xf32>
    %cst_3 = arith.constant 1.000000e-07 : f32
    %15 = vector.broadcast %cst_3 : f32 to vector<32x128xf32>
    %16 = arith.maximumf %14, %15 : vector<32x128xf32>
    %17 = vector.extract_strided_slice %11 {offsets = [0, 0], sizes = [32, 1], strides = [1, 1]} : vector<32x128xf32> to vector<32x1xf32>
    %cst_4 = arith.constant 1.000000e-07 : f32
    %18 = vector.broadcast %cst_4 : f32 to vector<32x1xf32>
    %19 = arith.maximumf %17, %18 : vector<32x1xf32>
    %c0_5 = arith.constant 0 : index
    %c0_6 = arith.constant 0 : index
    %20 = vector.load %arg2[%c0_5, %c0_6] : memref<32x128xbf16, #tpu.memory_space<vmem>>, vector<32x128xbf16>
    %cst_7 = arith.constant dense<0.000000e+00> : vector<32x256xf32>
    %21 = tpu.matmul %20, %0, %cst_7 {dimension_numbers = #tpu.dot_dimension_numbers<[1], [0], [0], [1], [0, 0, 1, 1], [], []>} : vector<32x128xbf16>, vector<128x256xbf16>, vector<32x256xf32> -> vector<32x256xf32>
    %22 = vector.extract_strided_slice %21 {offsets = [0, 0], sizes = [32, 128], strides = [1, 1]} : vector<32x256xf32> to vector<32x128xf32>
    %23 = vector.extract_strided_slice %21 {offsets = [0, 128], sizes = [32, 128], strides = [1, 1]} : vector<32x256xf32> to vector<32x128xf32>
    %24 = arith.mulf %22, %22 : vector<32x128xf32>
    %25 = arith.mulf %23, %23 : vector<32x128xf32>
    %26 = vector.broadcast %5 : vector<1x128xf32> to vector<32x128xf32>
    %27 = arith.mulf %25, %26 : vector<32x128xf32>
    %28 = arith.addf %24, %27 : vector<32x128xf32>
    %cst_8 = arith.constant 1.000000e-07 : f32
    %29 = vector.broadcast %cst_8 : f32 to vector<32x128xf32>
    %30 = arith.maximumf %28, %29 : vector<32x128xf32>
    %31 = vector.extract_strided_slice %25 {offsets = [0, 0], sizes = [32, 1], strides = [1, 1]} : vector<32x128xf32> to vector<32x1xf32>
    %cst_9 = arith.constant 1.000000e-07 : f32
    %32 = vector.broadcast %cst_9 : f32 to vector<32x1xf32>
    %33 = arith.maximumf %31, %32 : vector<32x1xf32>
    %34 = math.sqrt %30 : vector<32x128xf32>
    %35 = math.sqrt %16 : vector<32x128xf32>
    %36 = arith.subf %34, %35 : vector<32x128xf32>
    %37 = math.sqrt %33 : vector<32x1xf32>
    %38 = math.sqrt %19 : vector<32x1xf32>
    %39 = arith.subf %37, %38 : vector<32x1xf32>
    %40 = arith.mulf %36, %36 : vector<32x128xf32>
    %41 = vector.shape_cast %40 : vector<32x128xf32> to vector<1x32x128xf32>
    %cst_10 = arith.constant dense<0.000000e+00> : vector<1xf32>
    %42 = vector.multi_reduction <add>, %41, %cst_10 [1, 2] : vector<1x32x128xf32> to vector<1xf32>
    %43 = vector.shape_cast %42 : vector<1xf32> to vector<1x1x1xf32>
    %44 = vector.extract %43[0, 0, 0] : f32 from vector<1x1x1xf32>
    %45 = arith.mulf %39, %39 : vector<32x1xf32>
    %46 = vector.shape_cast %45 : vector<32x1xf32> to vector<1x32x1xf32>
    %cst_11 = arith.constant dense<0.000000e+00> : vector<1xf32>
    %47 = vector.multi_reduction <add>, %46, %cst_11 [1, 2] : vector<1x32x1xf32> to vector<1xf32>
    %48 = vector.shape_cast %47 : vector<1xf32> to vector<1x1x1xf32>
    %49 = vector.extract %48[0, 0, 0] : f32 from vector<1x1x1xf32>
    %50 = arith.addf %44, %49 : f32
    %51 = vector.shape_cast %30 : vector<32x128xf32> to vector<1x32x128xf32>
    %cst_12 = arith.constant dense<0.000000e+00> : vector<1xf32>
    %52 = vector.multi_reduction <add>, %51, %cst_12 [1, 2] : vector<1x32x128xf32> to vector<1xf32>
    %53 = vector.shape_cast %52 : vector<1xf32> to vector<1x1x1xf32>
    %54 = vector.extract %53[0, 0, 0] : f32 from vector<1x1x1xf32>
    %55 = vector.shape_cast %33 : vector<32x1xf32> to vector<1x32x1xf32>
    %cst_13 = arith.constant dense<0.000000e+00> : vector<1xf32>
    %56 = vector.multi_reduction <add>, %55, %cst_13 [1, 2] : vector<1x32x1xf32> to vector<1xf32>
    %57 = vector.shape_cast %56 : vector<1xf32> to vector<1x1x1xf32>
    %58 = vector.extract %57[0, 0, 0] : f32 from vector<1x1x1xf32>
    %59 = arith.addf %54, %58 : f32
    %60 = math.log %30 : vector<32x128xf32>
    %61 = math.log %16 : vector<32x128xf32>
    %62 = arith.subf %60, %61 : vector<32x128xf32>
    %63 = math.absf %62 : vector<32x128xf32>
    %64 = vector.shape_cast %63 : vector<32x128xf32> to vector<1x32x128xf32>
    %cst_14 = arith.constant dense<0.000000e+00> : vector<1xf32>
    %65 = vector.multi_reduction <add>, %64, %cst_14 [1, 2] : vector<1x32x128xf32> to vector<1xf32>
    %66 = vector.shape_cast %65 : vector<1xf32> to vector<1x1x1xf32>
    %67 = vector.extract %66[0, 0, 0] : f32 from vector<1x1x1xf32>
    %68 = math.log %33 : vector<32x1xf32>
    %69 = math.log %19 : vector<32x1xf32>
    %70 = arith.subf %68, %69 : vector<32x1xf32>
    %71 = math.absf %70 : vector<32x1xf32>
    %72 = vector.shape_cast %71 : vector<32x1xf32> to vector<1x32x1xf32>
    %cst_15 = arith.constant dense<0.000000e+00> : vector<1xf32>
    %73 = vector.multi_reduction <add>, %72, %cst_15 [1, 2] : vector<1x32x1xf32> to vector<1xf32>
    %74 = vector.shape_cast %73 : vector<1xf32> to vector<1x1x1xf32>
    %75 = vector.extract %74[0, 0, 0] : f32 from vector<1x1x1xf32>
    %76 = arith.addf %67, %75 : f32
    %cst_16 = arith.constant 5.000000e-01 : f32
    %77 = arith.mulf %cst_16, %76 : f32
    %78 = tpu.iota {dimensions = array<i32: 2>} : vector<1x8x128xi32>
    %c0_i32_17 = arith.constant 0 : i32
    %79 = vector.broadcast %c0_i32_17 : i32 to vector<1x8x128xi32>
    %80 = arith.cmpi eq, %78, %79 : vector<1x8x128xi32>
    %c1_i32 = arith.constant 1 : i32
    %81 = vector.broadcast %c1_i32 : i32 to vector<1x8x128xi32>
    %82 = arith.cmpi eq, %78, %81 : vector<1x8x128xi32>
    %c2_i32 = arith.constant 2 : i32
    %83 = vector.broadcast %c2_i32 : i32 to vector<1x8x128xi32>
    %84 = arith.cmpi eq, %78, %83 : vector<1x8x128xi32>
    %cst_18 = arith.constant 0.000000e+00 : f32
    %85 = vector.broadcast %77 : f32 to vector<1x8x128xf32>
    %86 = vector.broadcast %cst_18 : f32 to vector<1x8x128xf32>
    %87 = arith.select %84, %85, %86 : vector<1x8x128xi1>, vector<1x8x128xf32>
    %88 = vector.broadcast %59 : f32 to vector<1x8x128xf32>
    %89 = arith.select %82, %88, %87 : vector<1x8x128xi1>, vector<1x8x128xf32>
    %90 = vector.broadcast %50 : f32 to vector<1x8x128xf32>
    %91 = arith.select %80, %90, %89 : vector<1x8x128xi1>, vector<1x8x128xf32>
    %c0_19 = arith.constant 0 : index
    %c0_20 = arith.constant 0 : index
    %c0_21 = arith.constant 0 : index
    %92 = vector.load %arg4[%c0_19, %c0_20, %c0_21] : memref<1x8x128xf32, #tpu.memory_space<vmem>>, vector<1x8x128xf32>
    tpu.vector_store %arg4[%c0_19, %c0_20, %c0_21], %91 {strides = array<i32>} : memref<1x8x128xf32, #tpu.memory_space<vmem>>, vector<1x8x128xf32>,
    return
  }
  func.func @transform_0(%arg0: i32) -> (i32, i32) {
    %c0_i32 = arith.constant 0 : i32
    %c0_i32_0 = arith.constant 0 : i32
    return %arg0, %c0_i32 : i32, i32
  }
  func.func @transform_1(%arg0: i32) -> (i32, i32) {
    %c0_i32 = arith.constant 0 : i32
    %c0_i32_0 = arith.constant 0 : i32
    return %arg0, %c0_i32 : i32, i32
  }
  func.func @transform_2(%arg0: i32) -> (i32, i32) {
    %c0_i32 = arith.constant 0 : i32
    %c0_i32_0 = arith.constant 0 : i32
    %c0_i32_1 = arith.constant 0 : i32
    return %c0_i32, %c0_i32_0 : i32, i32
  }
  func.func @transform_3(%arg0: i32) -> (i32, i32, i32) {
    %c0_i32 = arith.constant 0 : i32
    %c0_i32_0 = arith.constant 0 : i32
    %c0_i32_1 = arith.constant 0 : i32
    return %arg0, %c0_i32, %c0_i32_0 : i32, i32, i32
  }
}

</mosaic_0001>

<bundles_post_ra>
// kernel: stft_loss.1
= control target key start
LH: loop header
LB: loop body
LE: loop exit
PB: predicated region body
PF: predicated region fallthrough
CT: control target
= control target key end

     0   :  { %v30_v52 = vlaneseq  ;;  %v808_v56 = vmov 0.0   ;;  %vm491_vm1 = vcmask 7168   ;;  %s1209_s2 = inlined_call_operand.vmem [shape: bf16[128,256], index: 2, kind: input, shape index: {}]   ;;  %s1210_s0 = inlined_call_operand.vmem [shape: bf16[32,128], index: 0, kind: input, shape index: {}]   ;;  %s1211_s1 = inlined_call_operand.vmem [shape: bf16[32,128], index: 1, kind: input, shape index: {}]   ;;  %s1212_s3 = inlined_call_operand.vmem [shape: f32[1,8,128], index: 3, kind: output, shape index: {}]  }
   0x1   :  { %v697_v0 = vld [vmem:[%s1209_s2 + $0x70] sm:$0xf]  ;;  %v726_v1 = vld [vmem:[%s1209_s2 + $0x74] sm:$0xf0]  ;;  %v725_v2 = vld [vmem:[%s1209_s2 + $0x74] sm:$0xf] }
   0x2   :  { %v698_v3 = vor.u32 %v726_v1, %v697_v0  ;;  %v699_v4 = vld [vmem:[%s1209_s2 + $0x78] sm:$0xf0]  ;;  %v689_v5 = vld [vmem:[%s1209_s2 + $0x60] sm:$0xf]  ;;  %v724_v6 = vld [vmem:[%s1209_s2 + $0x64] sm:$0xf0] }
   0x3   :  { %v702_v7 = vor.u32 %v725_v2, %v699_v4  ;;  %v723_v8 = vld [vmem:[%s1209_s2 + $0x64] sm:$0xf]  ;;  %v691_v9 = vld [vmem:[%s1209_s2 + $0x68] sm:$0xf0]  ;;  %v690_v10 = vor.u32 %v724_v6, %v689_v5  ;;  %v681_v12 = vld [vmem:[%s1209_s2 + $0x50] sm:$0xf] }
   0x4   :  { %131 = vmatpush.bf16.msra.mxu0 %v698_v3  ;;  %209 = vmatpush.bf16.msra.mxu2 %v698_v3  ;;  %v694_v11 = vor.u32 %v723_v8, %v691_v9  ;;  %v722_v13 = vld [vmem:[%s1209_s2 + $0x54] sm:$0xf0]  ;;  %v721_v14 = vld [vmem:[%s1209_s2 + $0x54] sm:$0xf]  ;;  %v683_v15 = vld [vmem:[%s1209_s2 + $0x58] sm:$0xf0] }
   0x5   :  { %150 = vmatpush.bf16.msra.mxu1 %v702_v7  ;;  %228 = vmatpush.bf16.msra.mxu3 %v702_v7  ;;  %v682_v16 = vor.u32 %v722_v13, %v681_v12  ;;  %v686_v17 = vor.u32 %v721_v14, %v683_v15  ;;  %v673_v18 = vld [vmem:[%s1209_s2 + $0x40] sm:$0xf]  ;;  %v720_v19 = vld [vmem:[%s1209_s2 + $0x44] sm:$0xf0]  ;;  %v719_v20 = vld [vmem:[%s1209_s2 + $0x44] sm:$0xf] }
   0x6   :  { %v675_v21 = vld [vmem:[%s1209_s2 + $0x48] sm:$0xf0]  ;;  %v674_v22 = vor.u32 %v720_v19, %v673_v18  ;;  %v665_v24 = vld [vmem:[%s1209_s2 + $0x30] sm:$0xf]  ;;  %v718_v25 = vld [vmem:[%s1209_s2 + $0x34] sm:$0xf0] }
   0x7   :  { %v678_v23 = vor.u32 %v719_v20, %v675_v21  ;;  %v717_v26 = vld [vmem:[%s1209_s2 + $0x34] sm:$0xf]  ;;  %v667_v27 = vld [vmem:[%s1209_s2 + $0x38] sm:$0xf0]  ;;  %v666_v28 = vor.u32 %v718_v25, %v665_v24  ;;  %v657_v30 = vld [vmem:[%s1209_s2 + $0x20] sm:$0xf] }
   0x8   :  { %132 = vmatpush.bf16.msra.mxu0 %v690_v10  ;;  %210 = vmatpush.bf16.msra.mxu2 %v690_v10  ;;  %v670_v29 = vor.u32 %v717_v26, %v667_v27  ;;  %v716_v31 = vld [vmem:[%s1209_s2 + $0x24] sm:$0xf0]  ;;  %v715_v32 = vld [vmem:[%s1209_s2 + $0x24] sm:$0xf]  ;;  %v659_v33 = vld [vmem:[%s1209_s2 + $0x28] sm:$0xf0] }
   0x9   :  { %151 = vmatpush.bf16.msra.mxu1 %v694_v11  ;;  %229 = vmatpush.bf16.msra.mxu3 %v694_v11  ;;  %v658_v34 = vor.u32 %v716_v31, %v657_v30  ;;  %v662_v35 = vor.u32 %v715_v32, %v659_v33  ;;  %v649_v36 = vld [vmem:[%s1209_s2 + $0x10] sm:$0xf]  ;;  %v714_v37 = vld [vmem:[%s1209_s2 + $0x14] sm:$0xf0]  ;;  %v713_v38 = vld [vmem:[%s1209_s2 + $0x14] sm:$0xf] }
   0xa   :  { %v651_v39 = vld [vmem:[%s1209_s2 + $0x18] sm:$0xf0]  ;;  %v650_v40 = vor.u32 %v714_v37, %v649_v36  ;;  %v641_v42 = vld [vmem:[%s1209_s2] sm:$0xf]  ;;  %v712_v43 = vld [vmem:[%s1209_s2 + $0x4] sm:$0xf0] }
   0xb   :  { %v654_v41 = vor.u32 %v713_v38, %v651_v39  ;;  %v711_v44 = vld [vmem:[%s1209_s2 + $0x4] sm:$0xf]  ;;  %v643_v45 = vld [vmem:[%s1209_s2 + $0x8] sm:$0xf0]  ;;  %v642_v46 = vor.u32 %v712_v43, %v641_v42  ;;  %v937_v53 = vand.u32 127, %v30_v52 }
   0xc   :  { %133 = vmatpush.bf16.msra.mxu0 %v682_v16  ;;  %211 = vmatpush.bf16.msra.mxu2 %v682_v16  ;;  %v646_v47 = vor.u32 %v711_v44, %v643_v45  ;;  %v727_v48 = vld [vmem:[%s1210_s0] sm:$0xff]  ;;  %v728_v50 = vld [vmem:[%s1210_s0 + $0x8] sm:$0xff] }
   0xd   :  { %152 = vmatpush.bf16.msra.mxu1 %v686_v17  ;;  %230 = vmatpush.bf16.msra.mxu3 %v686_v17  ;;  %v729_v49 = vld [vmem:[%s1211_s1] sm:$0xff]  ;;  %v730_v51 = vld [vmem:[%s1211_s1 + $0x8] sm:$0xff]  ;;  %vm32_vm0 = vcmp.gt.s32.totalorder %v937_v53, 0 }
   0xe   :  { %v940_v57 = vsel %vm32_vm0, 1.0, %v808_v56 }
  0x10   :  { %134 = vmatpush.bf16.msra.mxu0 %v674_v22  ;;  %212 = vmatpush.bf16.msra.mxu2 %v674_v22 }
  0x11   :  { %153 = vmatpush.bf16.msra.mxu1 %v678_v23  ;;  %231 = vmatpush.bf16.msra.mxu3 %v678_v23 }
  0x14   :  { %135 = vmatpush.bf16.msra.mxu0 %v666_v28  ;;  %213 = vmatpush.bf16.msra.mxu2 %v666_v28 }
  0x15   :  { %154 = vmatpush.bf16.msra.mxu1 %v670_v29  ;;  %232 = vmatpush.bf16.msra.mxu3 %v670_v29 }
  0x18   :  { %136 = vmatpush.bf16.msra.mxu0 %v658_v34  ;;  %214 = vmatpush.bf16.msra.mxu2 %v658_v34 }
  0x19   :  { %155 = vmatpush.bf16.msra.mxu1 %v662_v35  ;;  %233 = vmatpush.bf16.msra.mxu3 %v662_v35 }
  0x1c   :  { %137 = vmatpush.bf16.msra.mxu0 %v650_v40  ;;  %215 = vmatpush.bf16.msra.mxu2 %v650_v40 }
  0x1d   :  { %156 = vmatpush.bf16.msra.mxu1 %v654_v41  ;;  %234 = vmatpush.bf16.msra.mxu3 %v654_v41 }
  0x20   :  { %138 = vmatpush.bf16.msra.mxu0 %v642_v46  ;;  %216 = vmatpush.bf16.msra.mxu2 %v642_v46 }
  0x21   :  { %157 = vmatpush.bf16.msra.mxu1 %v646_v47  ;;  %235 = vmatpush.bf16.msra.mxu3 %v646_v47 }
  0x23   :  { %139 = vmatmul.bf16.vlgmr.msra.gmra.mxu0 %v727_v48  ;;  %217 = vmatmul.bf16.vlgmr.msra.gmra.mxu2 %v729_v49 }
  0x24   :  { %158 = vmatmul.bf16.vlgmr.msra.gmra.mxu1 %v727_v48  ;;  %236 = vmatmul.bf16.vlgmr.msra.gmra.mxu3 %v729_v49 }
  0x33   :  { %144 = vmatmul.bf16.gmra.mxu0 %v728_v50  ;;  %222 = vmatmul.bf16.gmra.mxu2 %v730_v51 }
  0x34   :  { %163 = vmatmul.bf16.gmra.mxu1 %v728_v50  ;;  %241 = vmatmul.bf16.gmra.mxu3 %v730_v51 }
  0xa0   :  { %v140_v54 = vpop.f32.mrf.mxu0 }
  0xa1   :  { %v159_v55 = vpop.f32.mrf.mxu1  ;;  %v169_v59 = vmul.f32 %v140_v54, %v140_v54 }
  0xa2   :  { %v173_v58 = vmul.f32 %v159_v55, %v159_v55 }
  0xa4   :  { %v177_v60 = vmul.f32 %v940_v57, %v173_v58  ;;  %v947_v9 = vmax.f32 %v173_v58, 1e-07 }
  0xa6   :  { %v218_v61 = vpop.f32.mrf.mxu2  ;;  %v181_v2 = vadd.f32 %v177_v60, %v169_v59  ;;  %744 = vlog2.f32 %v947_v9 }
  0xa7   :  { %v237_v62 = vpop.f32.mrf.mxu3  ;;  %v247_v63 = vmul.f32 %v218_v61, %v218_v61 }
  0xa8   :  { %v251_v0 = vmul.f32 %v237_v62, %v237_v62  ;;  %v142_v1 = vpop.f32.mrf.mxu0  ;;  %v945_v8 = vmax.f32 %v181_v2, 1e-07 }
  0xa9   :  { %v161_v3 = vpop.f32.mrf.mxu1  ;;  %v170_v10 = vmul.f32 %v142_v1, %v142_v1 }
  0xaa   :  { %v255_v4 = vmul.f32 %v940_v57, %v251_v0  ;;  %v174_v5 = vmul.f32 %v161_v3, %v161_v3  ;;  %v949_v11 = vmax.f32 %v251_v0, 1e-07  ;;  %746 = vlog2.f32 %v945_v8 }
  0xab   :  { %748 = vrsqrt.f32 %v945_v8  ;;  %v329_v2 = vand.u32 2147483648, %v945_v8  ;;  %vm326_vm7 = vcmp.eq.f32.partialorder %v945_v8, inf  ;;  %vm328_vm10 = vcmp.eq.f32.partialorder %v945_v8, 0.0 }
  0xac   :  { %v259_v6 = vadd.f32 %v255_v4, %v247_v63  ;;  %v178_v7 = vmul.f32 %v940_v57, %v174_v5  ;;  %v951_v14 = vmax.f32 %v174_v5, 1e-07  ;;  %750 = vlog2.f32 %v949_v11  ;;  %v745_v27 = vpop.eup %744 }
  0xad   :  { %v583_v54 = vmul.f32 0.6931472, %v745_v27  ;;  %v521_v1 = vsel %vm491_vm1, %v949_v11, 0.0 }
  0xae   :  { %v220_v12 = vpop.f32.mrf.mxu2  ;;  %v182_v13 = vadd.f32 %v178_v7, %v170_v10  ;;  %v954_v16 = vmax.f32 %v259_v6, 1e-07  ;;  %752 = vlog2.f32 %v951_v14 }
  0xaf   :  { %v239_v15 = vpop.f32.mrf.mxu3  ;;  %v248_v20 = vmul.f32 %v220_v12, %v220_v12 }
  0xb0   :  { %v252_v17 = vmul.f32 %v239_v15, %v239_v15  ;;  %v145_v18 = vpop.f32.mrf.mxu0  ;;  %v960_v23 = vmax.f32 %v182_v13, 1e-07  ;;  %754 = vrsqrt.f32 %v954_v16  ;;  %v747_v29 = vpop.eup %746  ;;  %vm278_vm2 = vcmp.eq.f32.partialorder %v954_v16, inf }
  0xb1   :  { %v164_v19 = vpop.f32.mrf.mxu1  ;;  %v171_v24 = vmul.f32 %v145_v18, %v145_v18  ;;  %756 = vrsqrt.f32 %v949_v11  ;;  %v971_v32 = vpop.eup %748  ;;  %v547_v5 = vmul.f32 0.6931472, %v747_v29  ;;  %vm280_vm3 = vcmp.eq.f32.partialorder %v954_v16, 0.0 }
  0xb2   :  { %v256_v21 = vmul.f32 %v940_v57, %v252_v17  ;;  %v175_v22 = vmul.f32 %v164_v19, %v164_v19  ;;  %v965_v28 = vmax.f32 %v252_v17, 1e-07  ;;  %758 = vlog2.f32 %v954_v16  ;;  %v751_v35 = vpop.eup %750 }
  0xb3   :  { %760 = vlog2.f32 %v960_v23  ;;  %v575_v60 = vmul.f32 0.6931472, %v751_v35  ;;  %v320_v6 = vmul.f32 %v971_v32, %v945_v8  ;;  %vm338_vm5 = vcmp.eq.f32.partialorder %v960_v23, inf }
  0xb4   :  { %v260_v25 = vadd.f32 %v256_v21, %v248_v20  ;;  %v179_v26 = vmul.f32 %v940_v57, %v175_v22  ;;  %762 = vrsqrt.f32 %v960_v23  ;;  %v753_v38 = vpop.eup %752  ;;  %v987_v48 = vmax.f32 %v175_v22, 1e-07 }
  0xb5   :  { %764 = vlog2.f32 %v965_v28  ;;  %v522_v12 = vsel %vm491_vm1, %v965_v28, 0.0  ;;  %v590_v20 = vsub.f32 %v575_v60, %v583_v54  ;;  %vm340_vm8 = vcmp.eq.f32.partialorder %v960_v23, 0.0 }
  0xb6   :  { %v968_v30 = vmax.f32 %v260_v25, 1e-07  ;;  %v223_v31 = vpop.f32.mrf.mxu2  ;;  %v183_v33 = vadd.f32 %v179_v26, %v171_v24  ;;  %v976_v41 = vpop.eup %754  ;;  %v585_v24 = vmul.f32 0.6931472, %v753_v38 }
  0xb7   :  { %v242_v34 = vpop.f32.mrf.mxu3  ;;  %v249_v36 = vmul.f32 %v223_v31, %v223_v31  ;;  %v980_v44 = vpop.eup %756  ;;  %v272_v55 = vmul.f32 %v976_v41, %v954_v16 }
  0xb8   :  { %v253_v37 = vmul.f32 %v242_v34, %v242_v34  ;;  %v147_v39 = vpop.f32.mrf.mxu0  ;;  %766 = vlog2.f32 %v968_v30  ;;  %v982_v45 = vmax.f32 %v183_v33, 1e-07  ;;  %v759_v47 = vpop.eup %758  ;;  %v509_v29 = vadd.f32 %v968_v30, %v954_v16 }
  0xb9   :  { %v166_v40 = vpop.f32.mrf.mxu1  ;;  %768 = vrsqrt.f32 %v968_v30  ;;  %v172_v50 = vmul.f32 %v147_v39, %v147_v39  ;;  %v761_v52 = vpop.eup %760  ;;  %v539_v13 = vmul.f32 0.6931472, %v759_v47  ;;  %v273_v15 = vmul.f32 %v976_v41, %v272_v55 }
  0xba   :  { %v257_v42 = vmul.f32 %v940_v57, %v253_v37  ;;  %v176_v43 = vmul.f32 %v166_v40, %v166_v40  ;;  %v984_v46 = vmax.f32 %v253_v37, 1e-07  ;;  %770 = vlog2.f32 %v982_v45  ;;  %v993_v56 = vpop.eup %762 }
  0xbb   :  { %772 = vlog2.f32 %v987_v48  ;;  %v765_v61 = vpop.eup %764  ;;  %v549_v33 = vmul.f32 0.6931472, %v761_v52  ;;  %v554_v34 = vsub.f32 %v539_v13, %v547_v5  ;;  %v274_v35 = vmul.f32 0.5, %v273_v15 }
  0xbc   :  { %v261_v49 = vadd.f32 %v257_v42, %v249_v36  ;;  %v180_v51 = vmul.f32 %v940_v57, %v176_v43  ;;  %v998_v62 = vmax.f32 %v176_v43, 1e-07  ;;  %774 = vlog2.f32 %v984_v46 }
  0xbd   :  { %v577_v22 = vmul.f32 0.6931472, %v765_v61  ;;  %v594_v40 = vand.u32 2147483647, %v590_v20  ;;  %v524_v54 = vsel %vm491_vm1, %v984_v46, 0.0  ;;  %v275_v60 = vsub.f32 1.5, %v274_v35 }
  0xbe   :  { %v995_v58 = vmax.f32 %v261_v49, 1e-07  ;;  %v184_v59 = vadd.f32 %v180_v51, %v172_v50  ;;  %v225_v63 = vpop.f32.mrf.mxu2  ;;  %v767_v3 = vpop.eup %766  ;;  %v281_v51 = vand.u32 2147483648, %v954_v16  ;;  %v558_v5 = vand.u32 2147483647, %v554_v34 }
  0xbf   :  { %v244_v0 = vpop.f32.mrf.mxu3  ;;  %v1007_v7 = vpop.eup %768  ;;  %v250_v17 = vmul.f32 %v225_v63, %v225_v63  ;;  %v541_v31 = vmul.f32 0.6931472, %v767_v3  ;;  %v591_v43 = vsub.f32 %v577_v22, %v585_v24  ;;  %v523_v63 = vadd.f32 %v522_v12, %v521_v1 }
  0xc0   :  { %v254_v4 = vmul.f32 %v244_v0, %v244_v0  ;;  %776 = vlog2.f32 %v995_v58  ;;  %v1009_v10 = vmax.f32 %v184_v59, 1e-07  ;;  %v771_v21 = vpop.eup %770  ;;  %v284_v25 = vmul.f32 %v1007_v7, %v968_v30 }
  0xc1   :  { %778 = vlog2.f32 %v998_v62  ;;  %v773_v26 = vpop.eup %772  ;;  %v510_v38 = vadd.f32 %v509_v29, %v995_v58  ;;  %v551_v39 = vmul.f32 0.6931472, %v771_v21  ;;  %v555_v50 = vsub.f32 %v541_v31, %v549_v33 }
  0xc2   :  { %v258_v18 = vmul.f32 %v940_v57, %v254_v4  ;;  %v1015_v19 = vmax.f32 %v254_v4, 1e-07  ;;  %v775_v57 = vpop.eup %774  ;;  %v285_v47 = vmul.f32 %v1007_v7, %v284_v25  ;;  %v587_v59 = vmul.f32 0.6931472, %v773_v26 }
  0xc3   :  { %v579_v55 = vmul.f32 0.6931472, %v775_v57  ;;  %v321_v3 = vmul.f32 %v971_v32, %v320_v6  ;;  %v595_v13 = vand.u32 2147483647, %v591_v43  ;;  %v598_v15 = vsel %vm491_vm1, %v594_v40, 0.0 }
  0xc4   :  { %v262_v27 = vadd.f32 %v258_v18, %v250_v17  ;;  %780 = vlog2.f32 %v1015_v19  ;;  %v286_v17 = vmul.f32 0.5, %v285_v47  ;;  %v525_v18 = vadd.f32 %v524_v54, %v523_v63 }
  0xc5   :  { %782 = vlog2.f32 %v1009_v10  ;;  %v526_v20 = vsel %vm491_vm1, %v1015_v19, 0.0  ;;  %v559_v21 = vand.u32 2147483647, %v555_v50  ;;  %v592_v1 = vsub.f32 %v579_v55, %v587_v59 }
  0xc6   :  { %v777_v36 = vpop.eup %776  ;;  %v1024_v37 = vmax.f32 %v262_v27, 1e-07  ;;  %784 = vrsqrt.f32 %v995_v58  ;;  %v276_v12 = vmul.f32 %v976_v41, %v275_v60  ;;  %v332_v6 = vmul.f32 %v993_v56, %v960_v23 }
  0xc7   :  { %v543_v42 = vmul.f32 0.6931472, %v777_v36  ;;  %v779_v52 = vpop.eup %778  ;;  %v287_v33 = vsub.f32 1.5, %v286_v17  ;;  %v322_v34 = vmul.f32 0.5, %v321_v3  ;;  %v562_v41 = vadd.f32 %v559_v21, %v558_v5 }
  0xc8   :  { %v511_v49 = vadd.f32 %v510_v38, %v1024_v37  ;;  %786 = vlog2.f32 %v1024_v37  ;;  %v589_v22 = vmul.f32 0.6931472, %v779_v52  ;;  %v333_v35 = vmul.f32 %v993_v56, %v332_v6 }
  0xc9   :  { %v556_v0 = vsub.f32 %v543_v42, %v551_v39  ;;  %788 = vrsqrt.f32 %v1024_v37  ;;  %v527_v38 = vadd.f32 %v526_v20, %v525_v18  ;;  %v599_v39 = vsel %vm491_vm1, %v595_v13, 0.0 }
  0xca   :  { %v781_v61 = vpop.eup %780  ;;  %512 = vadd.xlane.f32.xlu1 %v511_v49  ;;  %790 = vrsqrt.f32 %v982_v45  ;;  %v596_v47 = vand.u32 2147483647, %v592_v1  ;;  %v277_v52 = vmul.f32 %v276_v12, %v954_v16  ;;  %v334_v55 = vmul.f32 0.5, %v333_v35 }
  0xcb   :  { %v783_v4 = vpop.eup %782  ;;  %v581_v25 = vmul.f32 0.6931472, %v781_v61  ;;  %v560_v29 = vand.u32 2147483647, %v556_v0  ;;  %v288_v60 = vmul.f32 %v1007_v7, %v287_v33  ;;  %v323_v63 = vsub.f32 1.5, %v322_v34 }
  0xcc   :  { %v785_v24 = vpop.eup %784  ;;  %v553_v27 = vmul.f32 0.6931472, %v783_v4  ;;  %vm290_vm4 = vcmp.eq.f32.partialorder %v968_v30, inf  ;;  %v335_v4 = vsub.f32 1.5, %v334_v55  ;;  %792 = vrsqrt.f32 %v1009_v10 }
  0xcd   :  { %v296_v31 = vmul.f32 %v785_v24, %v995_v58  ;;  %v593_v43 = vsub.f32 %v581_v25, %v589_v22  ;;  %v563_v50 = vadd.f32 %v562_v41, %v560_v29  ;;  %vm292_vm6 = vcmp.eq.f32.partialorder %v968_v30, 0.0 }
  0xce   :  { %v787_v26 = vpop.eup %786  ;;  %v600_v20 = vadd.f32 %v599_v39, %v598_v15  ;;  %v601_v7 = vsel %vm491_vm1, %v596_v47, 0.0  ;;  %v336_v22 = vmul.f32 %v993_v56, %v335_v4  ;;  %v279_v25 = vsel %vm278_vm2, %v954_v16, %v277_v52 }
  0xcf   :  { %v545_v57 = vmul.f32 0.6931472, %v787_v26  ;;  %v789_v36 = vpop.eup %788  ;;  %v297_v40 = vmul.f32 %v785_v24, %v296_v31  ;;  %v597_v13 = vand.u32 2147483647, %v593_v43  ;;  %v289_v1 = vmul.f32 %v288_v60, %v968_v30 }
  0xd0   :  { %v308_v49 = vmul.f32 %v789_v36, %v1024_v37  ;;  %v791_v0 = vpop.eup %790  ;;  %v324_v12 = vmul.f32 %v971_v32, %v323_v63  ;;  %v293_v15 = vand.u32 2147483648, %v968_v30  ;;  %vm302_vm9 = vcmp.eq.f32.partialorder %v995_v58, inf }
  0xd1   :  { %v557_v42 = vsub.f32 %v545_v57, %v553_v27  ;;  %v298_v54 = vmul.f32 0.5, %v297_v40  ;;  %v344_v18 = vmul.f32 %v791_v0, %v982_v45  ;;  %v372_v56 = vmul.f32 %v980_v44, %v949_v11 }
  0xd2   :  { %528 = vadd.xlane.f32.xlu1 %v527_v38  ;;  %v309_v61 = vmul.f32 %v789_v36, %v308_v49  ;;  %v603_v26 = vsel %vm491_vm1, %v597_v13, 0.0  ;;  %v337_v29 = vmul.f32 %v336_v22, %v960_v23  ;;  %v793_v31 = vpop.eup %792  ;;  %v602_v57 = vadd.f32 %v601_v7, %v600_v20 }
  0xd3   :  { %v561_v59 = vand.u32 2147483647, %v557_v42  ;;  %v299_v3 = vsub.f32 1.5, %v298_v54  ;;  %v345_v6 = vmul.f32 %v791_v0, %v344_v18  ;;  %v282_v33 = vsel %vm280_vm3, %v281_v51, %v279_v25 }
  0xd4   :  { %v310_v17 = vmul.f32 0.5, %v309_v61  ;;  %vm304_vm11 = vcmp.eq.f32.partialorder %v995_v58, 0.0  ;;  %v305_v34 = vand.u32 2147483648, %v995_v58  ;;  %v291_v35 = vsel %vm290_vm4, %v968_v30, %v289_v1 }
  0xd5   :  { %v564_v5 = vadd.f32 %v563_v50, %v561_v59  ;;  %v300_v21 = vmul.f32 %v785_v24, %v299_v3  ;;  %v346_v32 = vmul.f32 0.5, %v345_v6  ;;  %vm314_vm12 = vcmp.eq.f32.partialorder %v1024_v37, inf }
  0xd6   :  { %v311_v24 = vsub.f32 1.5, %v310_v17  ;;  %v325_v38 = vmul.f32 %v324_v12, %v945_v8  ;;  %v373_v39 = vmul.f32 %v980_v44, %v372_v56  ;;  %v604_v40 = vadd.f32 %v603_v26, %v602_v57 }
  0xd7   :  { %565 = vadd.xlane.f32.xlu2 %v564_v5  ;;  %v301_v27 = vmul.f32 %v300_v21, %v995_v58  ;;  %v347_v41 = vsub.f32 1.5, %v346_v32  ;;  %v341_v16 = vand.u32 2147483648, %v960_v23  ;;  %v356_v51 = vmul.f32 %v793_v31, %v1009_v10 }
  0xd8   :  { %v312_v42 = vmul.f32 %v789_v36, %v311_v24  ;;  %v339_v47 = vsel %vm338_vm5, %v960_v23, %v337_v29  ;;  %794 = vrsqrt.f32 %v965_v28  ;;  %v294_v50 = vsel %vm292_vm6, %v293_v15, %v291_v35 }
  0xd9   :  { %v303_v43 = vsel %vm302_vm9, %v995_v58, %v301_v27  ;;  %v348_v49 = vmul.f32 %v791_v0, %v347_v41  ;;  %vm350_vm13 = vcmp.eq.f32.partialorder %v982_v45, inf  ;;  %v353_v36 = vand.u32 2147483648, %v982_v45 }
  0xda   :  { %v357_v52 = vmul.f32 %v793_v31, %v356_v51  ;;  %v327_v54 = vsel %vm326_vm7, %v945_v8, %v325_v38  ;;  %v374_v59 = vmul.f32 0.5, %v373_v39  ;;  %796 = vrsqrt.f32 %v984_v46 }
  0xdb   :  { %v349_v55 = vmul.f32 %v348_v49, %v982_v45  ;;  %v306_v60 = vsel %vm304_vm11, %v305_v34, %v303_v43  ;;  %v313_v30 = vmul.f32 %v312_v42, %v1024_v37  ;;  %v342_v61 = vsel %vm340_vm8, %v341_v16, %v339_v47 }
  0xdc   :  { %v358_v63 = vmul.f32 0.5, %v357_v52  ;;  %vm352_vm14 = vcmp.eq.f32.partialorder %v982_v45, 0.0  ;;  %v368_v3 = vsub.f32 %v294_v50, %v342_v61  ;;  %798 = vrsqrt.f32 %v1015_v19 }
  0xdd   :  { %v351_v0 = vsel %vm350_vm13, %v982_v45, %v349_v55  ;;  %vm316_vm15 = vcmp.eq.f32.partialorder %v1024_v37, 0.0  ;;  %v330_v58 = vsel %vm328_vm10, %v329_v2, %v327_v54  ;;  %v375_v18 = vsub.f32 1.5, %v374_v59 }
  0xde   :  { %v354_v4 = vsel %vm352_vm14, %v353_v36, %v351_v0  ;;  %v359_v5 = vsub.f32 1.5, %v358_v63  ;;  %v795_v13 = vpop.eup %794  ;;  %v367_v23 = vsub.f32 %v282_v33, %v330_v58  ;;  %800 = vrsqrt.f32 %v947_v9 }
  0xdf   :  { %605 = vadd.xlane.f32.xlu2 %v604_v40  ;;  %v369_v17 = vsub.f32 %v306_v60, %v354_v4  ;;  %v315_v45 = vsel %vm314_vm12, %v1024_v37, %v313_v30  ;;  %v317_v20 = vand.u32 2147483648, %v1024_v37  ;;  %v384_v21 = vmul.f32 %v795_v13, %v965_v28 }
  0xe0   :  { %v360_v7 = vmul.f32 %v793_v31, %v359_v5  ;;  %v797_v22 = vpop.eup %796  ;;  %vm362_vm0 = vcmp.eq.f32.partialorder %v1009_v10, inf  ;;  %vm364_vm2 = vcmp.eq.f32.partialorder %v1009_v10, 0.0  ;;  %v365_v8 = vand.u32 2147483648, %v1009_v10 }
  0xe1   :  { %v472_v2 = vmul.f32 %v368_v3, %v368_v3  ;;  %v385_v1 = vmul.f32 %v795_v13, %v384_v21  ;;  %v396_v12 = vmul.f32 %v797_v22, %v984_v46  ;;  %802 = vrsqrt.f32 %v951_v14 }
  0xe2   :  { %v361_v25 = vmul.f32 %v360_v7, %v1009_v10  ;;  %v799_v6 = vpop.eup %798  ;;  %v318_v15 = vsel %vm316_vm15, %v317_v20, %v315_v45  ;;  %v471_v24 = vmul.f32 %v367_v23, %v367_v23  ;;  %v473_v56 = vmul.f32 %v369_v17, %v369_v17 }
  0xe3   :  { %v376_v26 = vmul.f32 %v980_v44, %v375_v18  ;;  %v386_v29 = vmul.f32 0.5, %v385_v1  ;;  %v397_v32 = vmul.f32 %v797_v22, %v396_v12  ;;  %v408_v31 = vmul.f32 %v799_v6, %v1015_v19 }
  0xe4   :  { %v363_v27 = vsel %vm362_vm0, %v1009_v10, %v361_v25  ;;  %v801_v57 = vpop.eup %800  ;;  %v475_v34 = vadd.f32 %v472_v2, %v471_v24  ;;  %vm378_vm3 = vcmp.eq.f32.partialorder %v949_v11, inf  ;;  %804 = vrsqrt.f32 %v987_v48 }
  0xe5   :  { %v366_v33 = vsel %vm364_vm2, %v365_v8, %v363_v27  ;;  %v387_v35 = vsub.f32 1.5, %v386_v29  ;;  %v398_v38 = vmul.f32 0.5, %v397_v32  ;;  %v409_v41 = vmul.f32 %v799_v6, %v408_v31 }
  0xe6   :  { %v370_v37 = vsub.f32 %v318_v15, %v366_v33  ;;  %v476_v44 = vadd.f32 %v475_v34, %v473_v56  ;;  %v377_v39 = vmul.f32 %v376_v26, %v949_v11  ;;  %v420_v40 = vmul.f32 %v801_v57, %v947_v9 }
  0xe7   :  { %806 = vrsqrt.f32 %v998_v62  ;;  %v803_v42 = vpop.eup %802  ;;  %v388_v10 = vmul.f32 %v795_v13, %v387_v35  ;;  %v399_v51 = vsub.f32 1.5, %v398_v38  ;;  %v410_v43 = vmul.f32 0.5, %v409_v41 }
  0xe8   :  { %v474_v16 = vmul.f32 %v370_v37, %v370_v37  ;;  %vm380_vm4 = vcmp.eq.f32.partialorder %v949_v11, 0.0  ;;  %v381_v47 = vand.u32 2147483648, %v949_v11  ;;  %v421_v49 = vmul.f32 %v801_v57, %v420_v40 }
  0xe9   :  { %v432_v50 = vmul.f32 %v803_v42, %v951_v14  ;;  %vm390_vm5 = vcmp.eq.f32.partialorder %v965_v28, inf  ;;  %vm392_vm6 = vcmp.eq.f32.partialorder %v965_v28, 0.0  ;;  %v411_v52 = vsub.f32 1.5, %v410_v43 }
  0xea   :  { %v477_v36 = vadd.f32 %v476_v44, %v474_v16  ;;  %v805_v54 = vpop.eup %804  ;;  %v393_v55 = vand.u32 2147483648, %v965_v28  ;;  %vm402_vm7 = vcmp.eq.f32.partialorder %v984_v46, inf  ;;  %v422_v59 = vmul.f32 0.5, %v421_v49 }
  0xeb   :  { %v433_v60 = vmul.f32 %v803_v42, %v432_v50  ;;  %v379_v30 = vsel %vm378_vm3, %v949_v11, %v377_v39  ;;  %v389_v61 = vmul.f32 %v388_v10, %v965_v28  ;;  %v400_v63 = vmul.f32 %v797_v22, %v399_v51 }
  0xec   :  { %478 = vadd.xlane.f32.xlu0 %v477_v36  ;;  %v444_v0 = vmul.f32 %v805_v54, %v987_v48  ;;  %v405_v58 = vand.u32 2147483648, %v984_v46  ;;  %vm414_vm8 = vcmp.eq.f32.partialorder %v1015_v19, inf  ;;  %v423_v4 = vsub.f32 1.5, %v422_v59 }
  0xed   :  { %v807_v3 = vpop.eup %806  ;;  %v434_v5 = vmul.f32 0.5, %v433_v60  ;;  %vm404_vm9 = vcmp.eq.f32.partialorder %v984_v46, 0.0  ;;  %v412_v13 = vmul.f32 %v799_v6, %v411_v52  ;;  %v417_v23 = vand.u32 2147483648, %v1015_v19 }
  0xee   :  { %v445_v17 = vmul.f32 %v805_v54, %v444_v0  ;;  %v456_v18 = vmul.f32 %v807_v3, %v998_v62  ;;  %v382_v45 = vsel %vm380_vm4, %v381_v47, %v379_v30  ;;  %v424_v20 = vmul.f32 %v801_v57, %v423_v4 }
  0xef   :  { %vm426_vm10 = vcmp.eq.f32.partialorder %v947_v9, inf  ;;  %v435_v7 = vsub.f32 1.5, %v434_v5  ;;  %v391_v21 = vsel %vm390_vm5, %v965_v28, %v389_v61  ;;  %v401_v22 = vmul.f32 %v400_v63, %v984_v46 }
  0xf0   :  { %vm416_vm11 = vcmp.eq.f32.partialorder %v1015_v19, 0.0  ;;  %v446_v8 = vmul.f32 0.5, %v445_v17  ;;  %v457_v2 = vmul.f32 %v807_v3, %v456_v18  ;;  %v425_v25 = vmul.f32 %v424_v20, %v947_v9 }
  0xf1   :  { %vm428_vm12 = vcmp.eq.f32.partialorder %v947_v9, 0.0  ;;  %v429_v11 = vand.u32 2147483648, %v947_v9  ;;  %v436_v1 = vmul.f32 %v803_v42, %v435_v7  ;;  %v413_v12 = vmul.f32 %v412_v13, %v1015_v19 }
  0xf2   :  { %vm438_vm13 = vcmp.eq.f32.partialorder %v951_v14, inf  ;;  %v447_v6 = vsub.f32 1.5, %v446_v8  ;;  %v458_v15 = vmul.f32 0.5, %v457_v2  ;;  %v394_v24 = vsel %vm392_vm6, %v393_v55, %v391_v21 }
  0xf3   :  { %v427_v56 = vsel %vm426_vm10, %v947_v9, %v425_v25  ;;  %v437_v26 = vmul.f32 %v436_v1, %v951_v14  ;;  %v441_v27 = vand.u32 2147483648, %v951_v14  ;;  %v403_v29 = vsel %vm402_vm7, %v984_v46, %v401_v22 }
  0xf4   :  { %v430_v32 = vsel %vm428_vm12, %v429_v11, %v427_v56  ;;  %v448_v31 = vmul.f32 %v805_v54, %v447_v6  ;;  %v459_v57 = vsub.f32 1.5, %v458_v15  ;;  %vm440_vm14 = vcmp.eq.f32.partialorder %v951_v14, 0.0 }
  0xf5   :  { %v439_v33 = vsel %vm438_vm13, %v951_v14, %v437_v26  ;;  %vm450_vm15 = vcmp.eq.f32.partialorder %v987_v48, inf  ;;  %v467_v28 = vsub.f32 %v382_v45, %v430_v32  ;;  %v415_v9 = vsel %vm414_vm8, %v1015_v19, %v413_v12 }
  0xf6   :  { %v442_v34 = vsel %vm440_vm14, %v441_v27, %v439_v33  ;;  %v449_v37 = vmul.f32 %v448_v31, %v987_v48  ;;  %v460_v35 = vmul.f32 %v807_v3, %v459_v57  ;;  %v406_v38 = vsel %vm404_vm9, %v405_v58, %v403_v29 }
  0xf7   :  { %vm452_vm0 = vcmp.eq.f32.partialorder %v987_v48, 0.0  ;;  %v453_v41 = vand.u32 2147483648, %v987_v48  ;;  %v468_v44 = vsub.f32 %v394_v24, %v442_v34  ;;  %vm462_vm2 = vcmp.eq.f32.partialorder %v998_v62, inf }
  0xf8   :  { %v451_v14 = vsel %vm450_vm15, %v987_v48, %v449_v37  ;;  %v461_v39 = vmul.f32 %v460_v35, %v998_v62  ;;  %v487_v40 = vmul.f32 %v467_v28, %v467_v28  ;;  %v418_v42 = vsel %vm416_vm11, %v417_v23, %v415_v9 }
  0xf9   :  { %v454_v16 = vsel %vm452_vm0, %v453_v41, %v451_v14  ;;  %v465_v10 = vand.u32 2147483648, %v998_v62  ;;  %v488_v46 = vmul.f32 %v468_v44, %v468_v44  ;;  %vm464_vm3 = vcmp.eq.f32.partialorder %v998_v62, 0.0 }
  0xfa   :  { %v463_v51 = vsel %vm462_vm2, %v998_v62, %v461_v39  ;;  %v469_v43 = vsub.f32 %v406_v38, %v454_v16  ;;  %v492_v36 = vsel %vm491_vm1, %v487_v40, 0.0  ;;  %vm617_vm4 = vcmp.eq.s32.totalorder %v937_v53, 1 }
  0xfb   :  { %v466_v47 = vsel %vm464_vm3, %v465_v10, %v463_v51  ;;  %v493_v48 = vsel %vm491_vm1, %v488_v46, 0.0  ;;  %vm616_vm5 = vcmp.eq.s32.totalorder %v937_v53, 0 }
  0xfc   :  { %v470_v49 = vsub.f32 %v418_v42, %v466_v47  ;;  %v489_v50 = vmul.f32 %v469_v43, %v469_v43  ;;  %v494_v52 = vadd.f32 %v493_v48, %v492_v36 }
  0xfe   :  { %v490_v54 = vmul.f32 %v470_v49, %v470_v49  ;;  %v495_v19 = vsel %vm491_vm1, %v489_v50, 0.0 }
  0xff   :  { %v496_v55 = vadd.f32 %v495_v19, %v494_v52 }
 0x100   :  { %v497_v59 = vsel %vm491_vm1, %v490_v54, 0.0  ;;  %vm618_vm1 = vcmp.eq.s32.totalorder %v937_v53, 2 }
 0x101   :  { %v498_v60 = vadd.f32 %v497_v59, %v496_v55 }
 0x103   :  { %499 = vadd.xlane.f32.xlu0 %v498_v60 }
 0x13d   :  { %v513_v62 = vpop.xlane.xlu1 %512 }
 0x13e   :  { %v514_v23 = vrot.slane %v513_v62, 4 }
 0x140   :  { %v515_v7 = vadd.f32 %v514_v23, %v513_v62 }
 0x142   :  { %v516_v2 = vrot.slane %v515_v7, 2 }
 0x144   :  { %v517_v24 = vadd.f32 %v516_v2, %v515_v7 }
 0x145   :  { %v529_v13 = vpop.xlane.xlu1 %528 }
 0x146   :  { %v530_v18 = vrot.slane %v529_v13, 4  ;;  %v518_v31 = vrot.slane %v517_v24, 1 }
 0x148   :  { %v531_v21 = vadd.f32 %v530_v18, %v529_v13  ;;  %v519_v37 = vadd.f32 %v518_v31, %v517_v24 }
 0x14a   :  { %v566_v0 = vpop.xlane.xlu2 %565  ;;  %v532_v11 = vrot.slane %v531_v21, 2 }
 0x14b   :  { %v567_v45 = vrot.slane %v566_v0, 4 }
 0x14c   :  { %v533_v56 = vadd.f32 %v532_v11, %v531_v21 }
 0x14d   :  { %v568_v22 = vadd.f32 %v567_v45, %v566_v0 }
 0x14e   :  { %v534_v33 = vrot.slane %v533_v56, 1 }
 0x14f   :  { %v569_v12 = vrot.slane %v568_v22, 2 }
 0x150   :  { %v535_v35 = vadd.f32 %v534_v33, %v533_v56 }
 0x151   :  { %v570_v27 = vadd.f32 %v569_v12, %v568_v22 }
 0x152   :  { %v606_v17 = vpop.xlane.xlu2 %605 }
 0x153   :  { %v607_v20 = vrot.slane %v606_v17, 4  ;;  %v571_v28 = vrot.slane %v570_v27, 1 }
 0x155   :  { %v608_v8 = vadd.f32 %v607_v20, %v606_v17  ;;  %v572_v38 = vadd.f32 %v571_v28, %v570_v27 }
 0x157   :  { %v609_v6 = vrot.slane %v608_v8, 2 }
 0x159   :  { %v610_v29 = vadd.f32 %v609_v6, %v608_v8 }
 0x15b   :  { %v611_v34 = vrot.slane %v610_v29, 1 }
 0x15d   :  { %v612_v41 = vadd.f32 %v611_v34, %v610_v29 }
 0x15f   :  { %v479_v30 = vpop.xlane.xlu0 %478 }
 0x160   :  { %v480_v61 = vrot.slane %v479_v30, 4 }
 0x162   :  { %v481_v63 = vadd.f32 %v480_v61, %v479_v30 }
 0x164   :  { %v482_v3 = vrot.slane %v481_v63, 2 }
 0x166   :  { %v483_v58 = vadd.f32 %v482_v3, %v481_v63 }
 0x168   :  { %v484_v4 = vrot.slane %v483_v58, 1 }
 0x16a   :  { %v485_v5 = vadd.f32 %v484_v4, %v483_v58 }
 0x16c   :  { %731 = vpush %v485_v5 }
 0x176   :  { %v500_v25 = vpop.xlane.xlu0 %499 }
 0x177   :  { %v501_v1 = vrot.slane %v500_v25, 4 }
 0x179   :  { %v502_v15 = vadd.f32 %v501_v1, %v500_v25 }
 0x17b   :  { %v503_v26 = vrot.slane %v502_v15, 2 }
 0x17d   :  { %v504_v32 = vadd.f32 %v503_v26, %v502_v15 }
 0x17f   :  { %v505_v57 = vrot.slane %v504_v32, 1 }
 0x181   :  { %v506_v9 = vadd.f32 %v505_v57, %v504_v32 }
 0x183   :  { %733 = vpush %v506_v9 }
 0x184   :  { %735 = vpush %v519_v37 }
 0x185   :  { %737 = vpush %v535_v35 }
 0x186   :  { %739 = vpush %v572_v38 }
 0x187   :  { %741 = vpush %v612_v41 }
 0x19d   :  { %s732_s0 = spop %731 }
 0x1b4   :  { %s734_s1 = spop %733 }
 0x1b5   :  { %s736_s29 = spop %735  ;;  %s508_s8 = sadd.f32 %s734_s1, %s732_s0 }
 0x1b6   :  { %s738_s30 = spop %737 }
 0x1b7   :  { %s740_s4 = spop %739  ;;  %s537_s7 = sadd.f32 %s738_s30, %s736_s29  ;;  %v623_v40 = vstv %s508_s8 }
 0x1b8   :  { %s742_s5 = spop %741 }
 0x1b9   :  { %s614_s6 = sadd.f32 %s742_s5, %s740_s4  ;;  %v621_v14 = vstv %s537_s7 }
 0x1bb   :  { %s615_s9 = smul.f32 0.5, %s614_s6 }
 0x1bd   :  { %v619_v44 = vstv %s615_s9 }
 0x1be   :  { %v620_v39 = vsel %vm618_vm1, %v619_v44, 0.0 }
 0x1bf   :  { %v622_v42 = vsel %vm617_vm4, %v621_v14, %v620_v39 }
 0x1c0   :  { %v624_v16 = vsel %vm616_vm5, %v623_v40, %v622_v42 }
 0x1c1   :  { %625 = vst [vmem:[%s1212_s3] sm:$0xff] %v624_v16 }

</bundles_post_ra>
